<compile_context>
chip_gen: v5e
topology: v5e:2x2
jax: 0.10.0
libtpu: 0.0.40
codegen_flags: <defaults>
</compile_context>

<pallas_src>
import functools

import jax
import jax.numpy as jnp
from jax import lax
from jax.experimental import pallas as pl
from jax.experimental.pallas import tpu as pltpu

EPSILON = 1e-6


def _miou_kernel(x_ref, t_ref, inter_ref, union_ref, *, C, T, HW, need_mask):
    """One (batch, hw-tile) grid step.

    x_ref, t_ref         : (1, C, T, 128) logits / float targets (native dtype).
    inter_ref/union_ref  : (1, C, 128) per-batch accumulators, resident across the
                           hw-tile grid axis (lane-wise partial sums).
    """
    s = pl.program_id(1)

    @pl.when(s == 0)
    def _():
        inter_ref[...] = jnp.zeros_like(inter_ref)
        union_ref[...] = jnp.zeros_like(union_ref)

    # torch: binarize_probs(softmax(x, dim=1)) == one-hot of argmax over channels.
    # softmax is strictly monotone, so argmax(softmax(x)) == argmax(x); skip the softmax.
    # Running single-pass argmax over channels on dense (T, 128) tiles (VPU only);
    # strict '>' keeps the first occurrence on ties (torch/jnp argmax semantics).
    m = x_ref[0, 0].astype(jnp.float32)                       # (T, 128)
    amax = jnp.zeros((T, 128), dtype=jnp.int32)
    for c in range(1, C):
        xc = x_ref[0, c].astype(jnp.float32)
        better = xc > m
        amax = jnp.where(better, c, amax)
        m = jnp.where(better, xc, m)

    valid = None
    if need_mask:
        # Elements past H*W (lane-alignment padding and/or the OOB garbage region of a
        # partial last block) must not count toward any channel.
        row = lax.broadcasted_iota(jnp.int32, (T, 128), 0)
        lane = lax.broadcasted_iota(jnp.int32, (T, 128), 1)
        flat = (s * T + row) * 128 + lane
        valid = flat < HW
        amax = jnp.where(valid, amax, C)                      # sentinel: matches no channel

    # Per-channel partial sums; union = pred_count + target_sum - intersection
    # computed from reduced (1, 128) rows.
    for c in range(C):
        is_c = amax == c
        t_c = t_ref[0, c].astype(jnp.float32)                 # (T, 128)
        if need_mask:
            t_c = jnp.where(valid, t_c, 0.0)
        inter_r = jnp.sum(jnp.where(is_c, t_c, 0.0), axis=0, keepdims=True)   # (1, 128)
        cnt_r = jnp.sum(is_c.astype(jnp.float32), axis=0, keepdims=True)
        tsum_r = jnp.sum(t_c, axis=0, keepdims=True)
        inter_ref[0, c : c + 1, :] += inter_r
        union_ref[0, c : c + 1, :] += cnt_r + tsum_r - inter_r


def mean_iou(inputs, targets, epsilon=EPSILON):
    """inputs, targets: (N, C, H, W) float arrays. Returns scalar mean IoU (float32)."""
    assert inputs.shape == targets.shape, "inputs and targets must have the same shape"
    N, C, H, W = inputs.shape
    HW = H * W
    S = pl.cdiv(HW, 128)          # 128-lane rows
    S_eff = max(S, 8)             # keep at least one full (8,128) sublane tile
    pad = S_eff * 128 - HW        # 0 when H*W is already a multiple of 128 (and >= 1024)

    itemsize = max(jnp.dtype(inputs.dtype).itemsize, jnp.dtype(targets.dtype).itemsize)
    # HW tile of T sublane-rows x 128 lanes; <= ~4 MiB per input block so that
    # 2 inputs x 2 pipeline buffers stay well inside VMEM on every chip.
    budget_rows = (4 * 1024 * 1024) // (C * 128 * itemsize)
    T = max(8, min(1024, (budget_rows // 8) * 8, (S_eff // 8) * 8))
    num_tiles = pl.cdiv(S_eff, T)
    # Mask whenever the tiled extent overshoots H*W (alignment pad or partial last tile).
    need_mask = num_tiles * T * 128 != HW

    # No wrapper astype: keep native dtypes in HBM, cast inside the kernel.
    x = inputs.reshape(N, C, HW)
    t = targets.reshape(N, C, HW)
    if pad:
        # Only when H*W is not lane-aligned (or tiny); otherwise the reshape below is a
        # zero-copy bitcast and the kernel masks the partial last tile in-register.
        x = jnp.pad(x, ((0, 0), (0, 0), (0, pad)))
        t = jnp.pad(t, ((0, 0), (0, 0), (0, pad)))
    x = x.reshape(N, C, S_eff, 128)
    t = t.reshape(N, C, S_eff, 128)

    kernel = functools.partial(_miou_kernel, C=C, T=T, HW=HW, need_mask=need_mask)

    block_bytes = C * T * 128 * itemsize
    vmem_limit = min(max(4 * block_bytes + (2 << 20), 16 << 20), 56 << 20)

    inter, union = pl.pallas_call(
        kernel,
        out_shape=(
            jax.ShapeDtypeStruct((N, C, 128), jnp.float32),
            jax.ShapeDtypeStruct((N, C, 128), jnp.float32),
        ),
        grid_spec=pltpu.PrefetchScalarGridSpec(
            num_scalar_prefetch=0,
            grid=(N, num_tiles),
            in_specs=[
                pl.BlockSpec((1, C, T, 128), lambda n, s: (n, 0, s, 0)),
                pl.BlockSpec((1, C, T, 128), lambda n, s: (n, 0, s, 0)),
            ],
            out_specs=[
                pl.BlockSpec((1, C, 128), lambda n, s: (n, 0, 0)),
                pl.BlockSpec((1, C, 128), lambda n, s: (n, 0, 0)),
            ],
        ),
        compiler_params=pltpu.CompilerParams(
            dimension_semantics=("parallel", "arbitrary"),
            vmem_limit_bytes=vmem_limit,
        ),
    )(x, t)

    # TODO(synk): optional per-class `weights` buffer (None by default in the module)
    # would scale `inter_nc` here before the divide; not plumbed.
    inter_nc = jnp.sum(inter, axis=-1)                        # (N, C)
    union_nc = jnp.sum(union, axis=-1)                        # (N, C)
    iou = inter_nc / jnp.maximum(union_nc, jnp.float32(epsilon))
    # torch: mean over batch per channel, then mean over channels == global mean over (N, C)
    return jnp.mean(iou)


def _mean_iou_ref(inputs, targets, epsilon=EPSILON):
    """Pure-JAX reference mirroring the PyTorch module."""
    C = inputs.shape[1]
    probs = jax.nn.softmax(inputs, axis=1)
    preds = jax.nn.one_hot(jnp.argmax(probs, axis=1), C, axis=1, dtype=jnp.float32)
    t = targets.astype(jnp.float32)
    inter = jnp.sum(preds * t, axis=(2, 3)).T                 # (C, N)
    union = jnp.sum(preds + t - preds * t, axis=(2, 3)).T     # (C, N)
    iou = inter / jnp.maximum(union, epsilon)
    return jnp.mean(jnp.mean(iou, axis=1))


if __name__ == "__main__":
    key = jax.random.PRNGKey(0)
    k1, k2 = jax.random.split(key)

    N, C, H, W = 2, 4, 16, 16
    inputs = jax.random.normal(k1, (N, C, H, W), dtype=jnp.float32)
    labels = jax.random.randint(k2, (N, H, W), 0, C)
    targets = jax.nn.one_hot(labels, C, axis=1, dtype=jnp.float32)

    out = jax.block_until_ready(mean_iou(inputs, targets))
    ref = _mean_iou_ref(inputs, targets)
    assert jnp.allclose(out, ref, atol=1e-5, rtol=1e-5), (out, ref)

    print("KERNEL_OK")
</pallas_src>

<mosaic_0001>
module attributes {stable_mosaic.version = 11 : i64} {
  func.func @_miou_kernel(%arg0: i32, %arg1: i32, %arg2: memref<1x4x8x128xf32, #tpu.memory_space<vmem>>, %arg3: memref<1x4x8x128xf32, #tpu.memory_space<vmem>>, %arg4: memref<1x4x128xf32, #tpu.memory_space<vmem>>, %arg5: memref<1x4x128xf32, #tpu.memory_space<vmem>>) attributes {dimension_semantics = [#tpu.dimension_semantics<parallel>, #tpu.dimension_semantics<arbitrary>], iteration_bounds = array<i64: 2, 1>, scalar_prefetch = 0 : i64, scratch_operands = 0 : i64, tpu.core_type = #tpu.core_type<tc>, window_params = [{transform_indices = @transform_0, window_bounds = array<i64: 1, 4, 8, 128>}, {transform_indices = @transform_1, window_bounds = array<i64: 1, 4, 8, 128>}, {transform_indices = @transform_2, window_bounds = array<i64: 1, 4, 128>}, {transform_indices = @transform_3, window_bounds = array<i64: 1, 4, 128>}]} {
    %c0_i32 = arith.constant 0 : i32
    %0 = arith.cmpi eq, %arg1, %c0_i32 : i32
    %1 = arith.extui %0 : i1 to i32
    %c0_i32_0 = arith.constant 0 : i32
    %2 = arith.cmpi ne, %1, %c0_i32_0 : i32
    scf.if %2 {
      %cst_101 = arith.constant 0.000000e+00 : f32
      %155 = vector.broadcast %cst_101 : f32 to vector<1x4x128xf32>
      %c0_102 = arith.constant 0 : index
      %c0_103 = arith.constant 0 : index
      %c0_104 = arith.constant 0 : index
      %156 = vector.load %arg4[%c0_102, %c0_103, %c0_104] : memref<1x4x128xf32, #tpu.memory_space<vmem>>, vector<1x4x128xf32>
      tpu.vector_store %arg4[%c0_102, %c0_103, %c0_104], %155 {strides = array<i32>} : memref<1x4x128xf32, #tpu.memory_space<vmem>>, vector<1x4x128xf32>,
      %cst_105 = arith.constant 0.000000e+00 : f32
      %157 = vector.broadcast %cst_105 : f32 to vector<1x4x128xf32>
      %c0_106 = arith.constant 0 : index
      %c0_107 = arith.constant 0 : index
      %c0_108 = arith.constant 0 : index
      %158 = vector.load %arg5[%c0_106, %c0_107, %c0_108] : memref<1x4x128xf32, #tpu.memory_space<vmem>>, vector<1x4x128xf32>
      tpu.vector_store %arg5[%c0_106, %c0_107, %c0_108], %157 {strides = array<i32>} : memref<1x4x128xf32, #tpu.memory_space<vmem>>, vector<1x4x128xf32>,
    } else {
    }
    %c0 = arith.constant 0 : index
    %c0_1 = arith.constant 0 : index
    %c0_2 = arith.constant 0 : index
    %c0_3 = arith.constant 0 : index
    %3 = vector.load %arg2[%c0, %c0_1, %c0_2, %c0_3] : memref<1x4x8x128xf32, #tpu.memory_space<vmem>>, vector<1x1x8x128xf32>
    %4 = vector.shape_cast %3 : vector<1x1x8x128xf32> to vector<8x128xf32>
    %c0_i32_4 = arith.constant 0 : i32
    %5 = vector.broadcast %c0_i32_4 : i32 to vector<8x128xi32>
    %c0_5 = arith.constant 0 : index
    %c1 = arith.constant 1 : index
    %c0_6 = arith.constant 0 : index
    %c0_7 = arith.constant 0 : index
    %6 = vector.load %arg2[%c0_5, %c1, %c0_6, %c0_7] : memref<1x4x8x128xf32, #tpu.memory_space<vmem>>, vector<1x1x8x128xf32>
    %7 = vector.shape_cast %6 : vector<1x1x8x128xf32> to vector<8x128xf32>
    %8 = arith.cmpf ogt, %7, %4 : vector<8x128xf32>
    %c1_i32 = arith.constant 1 : i32
    %9 = vector.broadcast %c1_i32 : i32 to vector<8x128xi32>
    %10 = arith.select %8, %9, %5 : vector<8x128xi1>, vector<8x128xi32>
    %11 = arith.select %8, %7, %4 : vector<8x128xi1>, vector<8x128xf32>
    %c0_8 = arith.constant 0 : index
    %c2 = arith.constant 2 : index
    %c0_9 = arith.constant 0 : index
    %c0_10 = arith.constant 0 : index
    %12 = vector.load %arg2[%c0_8, %c2, %c0_9, %c0_10] : memref<1x4x8x128xf32, #tpu.memory_space<vmem>>, vector<1x1x8x128xf32>
    %13 = vector.shape_cast %12 : vector<1x1x8x128xf32> to vector<8x128xf32>
    %14 = arith.cmpf ogt, %13, %11 : vector<8x128xf32>
    %c2_i32 = arith.constant 2 : i32
    %15 = vector.broadcast %c2_i32 : i32 to vector<8x128xi32>
    %16 = arith.select %14, %15, %10 : vector<8x128xi1>, vector<8x128xi32>
    %17 = arith.select %14, %13, %11 : vector<8x128xi1>, vector<8x128xf32>
    %c0_11 = arith.constant 0 : index
    %c3 = arith.constant 3 : index
    %c0_12 = arith.constant 0 : index
    %c0_13 = arith.constant 0 : index
    %18 = vector.load %arg2[%c0_11, %c3, %c0_12, %c0_13] : memref<1x4x8x128xf32, #tpu.memory_space<vmem>>, vector<1x1x8x128xf32>
    %19 = vector.shape_cast %18 : vector<1x1x8x128xf32> to vector<8x128xf32>
    %20 = arith.cmpf ogt, %19, %17 : vector<8x128xf32>
    %c3_i32 = arith.constant 3 : i32
    %21 = vector.broadcast %c3_i32 : i32 to vector<8x128xi32>
    %22 = arith.select %20, %21, %16 : vector<8x128xi1>, vector<8x128xi32>
    %23 = tpu.iota {dimensions = array<i32: 0>} : vector<8x128xi32>
    %24 = tpu.iota {dimensions = array<i32: 1>} : vector<8x128xi32>
    %c8_i32 = arith.constant 8 : i32
    %25 = arith.muli %arg1, %c8_i32 : i32
    %26 = vector.broadcast %25 : i32 to vector<8x128xi32>
    %27 = arith.addi %26, %23 : vector<8x128xi32>
    %c128_i32 = arith.constant 128 : i32
    %28 = vector.broadcast %c128_i32 : i32 to vector<8x128xi32>
    %29 = arith.muli %27, %28 : vector<8x128xi32>
    %30 = arith.addi %29, %24 : vector<8x128xi32>
    %c256_i32 = arith.constant 256 : i32
    %31 = vector.broadcast %c256_i32 : i32 to vector<8x128xi32>
    %32 = arith.cmpi slt, %30, %31 : vector<8x128xi32>
    %c4_i32 = arith.constant 4 : i32
    %33 = vector.broadcast %c4_i32 : i32 to vector<8x128xi32>
    %34 = arith.select %32, %22, %33 : vector<8x128xi1>, vector<8x128xi32>
    %c0_i32_14 = arith.constant 0 : i32
    %35 = vector.broadcast %c0_i32_14 : i32 to vector<8x128xi32>
    %36 = arith.cmpi eq, %34, %35 : vector<8x128xi32>
    %c0_15 = arith.constant 0 : index
    %c0_16 = arith.constant 0 : index
    %c0_17 = arith.constant 0 : index
    %c0_18 = arith.constant 0 : index
    %37 = vector.load %arg3[%c0_15, %c0_16, %c0_17, %c0_18] : memref<1x4x8x128xf32, #tpu.memory_space<vmem>>, vector<1x1x8x128xf32>
    %38 = vector.shape_cast %37 : vector<1x1x8x128xf32> to vector<8x128xf32>
    %cst = arith.constant 0.000000e+00 : f32
    %39 = vector.broadcast %cst : f32 to vector<8x128xf32>
    %40 = arith.select %32, %38, %39 : vector<8x128xi1>, vector<8x128xf32>
    %cst_19 = arith.constant 0.000000e+00 : f32
    %41 = vector.broadcast %cst_19 : f32 to vector<8x128xf32>
    %42 = arith.select %36, %40, %41 : vector<8x128xi1>, vector<8x128xf32>
    %cst_20 = arith.constant dense<0.000000e+00> : vector<128xf32>
    %43 = vector.multi_reduction <add>, %42, %cst_20 [0] : vector<8x128xf32> to vector<128xf32>
    %44 = vector.shape_cast %43 : vector<128xf32> to vector<1x128xf32>
    %45 = arith.extui %36 : vector<8x128xi1> to vector<8x128xi32>
    %46 = arith.sitofp %45 : vector<8x128xi32> to vector<8x128xf32>
    %cst_21 = arith.constant dense<0.000000e+00> : vector<128xf32>
    %47 = vector.multi_reduction <add>, %46, %cst_21 [0] : vector<8x128xf32> to vector<128xf32>
    %48 = vector.shape_cast %47 : vector<128xf32> to vector<1x128xf32>
    %cst_22 = arith.constant dense<0.000000e+00> : vector<128xf32>
    %49 = vector.multi_reduction <add>, %40, %cst_22 [0] : vector<8x128xf32> to vector<128xf32>
    %50 = vector.shape_cast %49 : vector<128xf32> to vector<1x128xf32>
    %c0_23 = arith.constant 0 : index
    %c0_24 = arith.constant 0 : index
    %c0_25 = arith.constant 0 : index
    %51 = vector.load %arg4[%c0_23, %c0_24, %c0_25] : memref<1x4x128xf32, #tpu.memory_space<vmem>>, vector<1x1x128xf32>
    %52 = vector.shape_cast %51 : vector<1x1x128xf32> to vector<1x128xf32>
    %53 = arith.addf %52, %44 : vector<1x128xf32>
    %c0_26 = arith.constant 0 : index
    %c0_27 = arith.constant 0 : index
    %c0_28 = arith.constant 0 : index
    %54 = vector.load %arg4[%c0_26, %c0_27, %c0_28] : memref<1x4x128xf32, #tpu.memory_space<vmem>>, vector<1x1x128xf32>
    %55 = vector.shape_cast %54 : vector<1x1x128xf32> to vector<1x128xf32>
    %56 = vector.shape_cast %53 : vector<1x128xf32> to vector<1x1x128xf32>
    tpu.vector_store %arg4[%c0_26, %c0_27, %c0_28], %56 {strides = array<i32>} : memref<1x4x128xf32, #tpu.memory_space<vmem>>, vector<1x1x128xf32>,
    %c0_29 = arith.constant 0 : index
    %c0_30 = arith.constant 0 : index
    %c0_31 = arith.constant 0 : index
    %57 = vector.load %arg5[%c0_29, %c0_30, %c0_31] : memref<1x4x128xf32, #tpu.memory_space<vmem>>, vector<1x1x128xf32>
    %58 = vector.shape_cast %57 : vector<1x1x128xf32> to vector<1x128xf32>
    %59 = arith.addf %48, %50 : vector<1x128xf32>
    %60 = arith.subf %59, %44 : vector<1x128xf32>
    %61 = arith.addf %58, %60 : vector<1x128xf32>
    %c0_32 = arith.constant 0 : index
    %c0_33 = arith.constant 0 : index
    %c0_34 = arith.constant 0 : index
    %62 = vector.load %arg5[%c0_32, %c0_33, %c0_34] : memref<1x4x128xf32, #tpu.memory_space<vmem>>, vector<1x1x128xf32>
    %63 = vector.shape_cast %62 : vector<1x1x128xf32> to vector<1x128xf32>
    %64 = vector.shape_cast %61 : vector<1x128xf32> to vector<1x1x128xf32>
    tpu.vector_store %arg5[%c0_32, %c0_33, %c0_34], %64 {strides = array<i32>} : memref<1x4x128xf32, #tpu.memory_space<vmem>>, vector<1x1x128xf32>,
    %c1_i32_35 = arith.constant 1 : i32
    %65 = vector.broadcast %c1_i32_35 : i32 to vector<8x128xi32>
    %66 = arith.cmpi eq, %34, %65 : vector<8x128xi32>
    %c0_36 = arith.constant 0 : index
    %c1_37 = arith.constant 1 : index
    %c0_38 = arith.constant 0 : index
    %c0_39 = arith.constant 0 : index
    %67 = vector.load %arg3[%c0_36, %c1_37, %c0_38, %c0_39] : memref<1x4x8x128xf32, #tpu.memory_space<vmem>>, vector<1x1x8x128xf32>
    %68 = vector.shape_cast %67 : vector<1x1x8x128xf32> to vector<8x128xf32>
    %cst_40 = arith.constant 0.000000e+00 : f32
    %69 = vector.broadcast %cst_40 : f32 to vector<8x128xf32>
    %70 = arith.select %32, %68, %69 : vector<8x128xi1>, vector<8x128xf32>
    %cst_41 = arith.constant 0.000000e+00 : f32
    %71 = vector.broadcast %cst_41 : f32 to vector<8x128xf32>
    %72 = arith.select %66, %70, %71 : vector<8x128xi1>, vector<8x128xf32>
    %cst_42 = arith.constant dense<0.000000e+00> : vector<128xf32>
    %73 = vector.multi_reduction <add>, %72, %cst_42 [0] : vector<8x128xf32> to vector<128xf32>
    %74 = vector.shape_cast %73 : vector<128xf32> to vector<1x128xf32>
    %75 = arith.extui %66 : vector<8x128xi1> to vector<8x128xi32>
    %76 = arith.sitofp %75 : vector<8x128xi32> to vector<8x128xf32>
    %cst_43 = arith.constant dense<0.000000e+00> : vector<128xf32>
    %77 = vector.multi_reduction <add>, %76, %cst_43 [0] : vector<8x128xf32> to vector<128xf32>
    %78 = vector.shape_cast %77 : vector<128xf32> to vector<1x128xf32>
    %cst_44 = arith.constant dense<0.000000e+00> : vector<128xf32>
    %79 = vector.multi_reduction <add>, %70, %cst_44 [0] : vector<8x128xf32> to vector<128xf32>
    %80 = vector.shape_cast %79 : vector<128xf32> to vector<1x128xf32>
    %c0_45 = arith.constant 0 : index
    %c1_46 = arith.constant 1 : index
    %c0_47 = arith.constant 0 : index
    %81 = vector.load %arg4[%c0_45, %c1_46, %c0_47] : memref<1x4x128xf32, #tpu.memory_space<vmem>>, vector<1x1x128xf32>
    %82 = vector.shape_cast %81 : vector<1x1x128xf32> to vector<1x128xf32>
    %83 = arith.addf %82, %74 : vector<1x128xf32>
    %c0_48 = arith.constant 0 : index
    %c1_49 = arith.constant 1 : index
    %c0_50 = arith.constant 0 : index
    %84 = vector.load %arg4[%c0_48, %c1_49, %c0_50] : memref<1x4x128xf32, #tpu.memory_space<vmem>>, vector<1x1x128xf32>
    %85 = vector.shape_cast %84 : vector<1x1x128xf32> to vector<1x128xf32>
    %86 = vector.shape_cast %83 : vector<1x128xf32> to vector<1x1x128xf32>
    tpu.vector_store %arg4[%c0_48, %c1_49, %c0_50], %86 {strides = array<i32>} : memref<1x4x128xf32, #tpu.memory_space<vmem>>, vector<1x1x128xf32>,
    %c0_51 = arith.constant 0 : index
    %c1_52 = arith.constant 1 : index
    %c0_53 = arith.constant 0 : index
    %87 = vector.load %arg5[%c0_51, %c1_52, %c0_53] : memref<1x4x128xf32, #tpu.memory_space<vmem>>, vector<1x1x128xf32>
    %88 = vector.shape_cast %87 : vector<1x1x128xf32> to vector<1x128xf32>
    %89 = arith.addf %78, %80 : vector<1x128xf32>
    %90 = arith.subf %89, %74 : vector<1x128xf32>
    %91 = arith.addf %88, %90 : vector<1x128xf32>
    %c0_54 = arith.constant 0 : index
    %c1_55 = arith.constant 1 : index
    %c0_56 = arith.constant 0 : index
    %92 = vector.load %arg5[%c0_54, %c1_55, %c0_56] : memref<1x4x128xf32, #tpu.memory_space<vmem>>, vector<1x1x128xf32>
    %93 = vector.shape_cast %92 : vector<1x1x128xf32> to vector<1x128xf32>
    %94 = vector.shape_cast %91 : vector<1x128xf32> to vector<1x1x128xf32>
    tpu.vector_store %arg5[%c0_54, %c1_55, %c0_56], %94 {strides = array<i32>} : memref<1x4x128xf32, #tpu.memory_space<vmem>>, vector<1x1x128xf32>,
    %c2_i32_57 = arith.constant 2 : i32
    %95 = vector.broadcast %c2_i32_57 : i32 to vector<8x128xi32>
    %96 = arith.cmpi eq, %34, %95 : vector<8x128xi32>
    %c0_58 = arith.constant 0 : index
    %c2_59 = arith.constant 2 : index
    %c0_60 = arith.constant 0 : index
    %c0_61 = arith.constant 0 : index
    %97 = vector.load %arg3[%c0_58, %c2_59, %c0_60, %c0_61] : memref<1x4x8x128xf32, #tpu.memory_space<vmem>>, vector<1x1x8x128xf32>
    %98 = vector.shape_cast %97 : vector<1x1x8x128xf32> to vector<8x128xf32>
    %cst_62 = arith.constant 0.000000e+00 : f32
    %99 = vector.broadcast %cst_62 : f32 to vector<8x128xf32>
    %100 = arith.select %32, %98, %99 : vector<8x128xi1>, vector<8x128xf32>
    %cst_63 = arith.constant 0.000000e+00 : f32
    %101 = vector.broadcast %cst_63 : f32 to vector<8x128xf32>
    %102 = arith.select %96, %100, %101 : vector<8x128xi1>, vector<8x128xf32>
    %cst_64 = arith.constant dense<0.000000e+00> : vector<128xf32>
    %103 = vector.multi_reduction <add>, %102, %cst_64 [0] : vector<8x128xf32> to vector<128xf32>
    %104 = vector.shape_cast %103 : vector<128xf32> to vector<1x128xf32>
    %105 = arith.extui %96 : vector<8x128xi1> to vector<8x128xi32>
    %106 = arith.sitofp %105 : vector<8x128xi32> to vector<8x128xf32>
    %cst_65 = arith.constant dense<0.000000e+00> : vector<128xf32>
    %107 = vector.multi_reduction <add>, %106, %cst_65 [0] : vector<8x128xf32> to vector<128xf32>
    %108 = vector.shape_cast %107 : vector<128xf32> to vector<1x128xf32>
    %cst_66 = arith.constant dense<0.000000e+00> : vector<128xf32>
    %109 = vector.multi_reduction <add>, %100, %cst_66 [0] : vector<8x128xf32> to vector<128xf32>
    %110 = vector.shape_cast %109 : vector<128xf32> to vector<1x128xf32>
    %c0_67 = arith.constant 0 : index
    %c2_68 = arith.constant 2 : index
    %c0_69 = arith.constant 0 : index
    %111 = vector.load %arg4[%c0_67, %c2_68, %c0_69] : memref<1x4x128xf32, #tpu.memory_space<vmem>>, vector<1x1x128xf32>
    %112 = vector.shape_cast %111 : vector<1x1x128xf32> to vector<1x128xf32>
    %113 = arith.addf %112, %104 : vector<1x128xf32>
    %c0_70 = arith.constant 0 : index
    %c2_71 = arith.constant 2 : index
    %c0_72 = arith.constant 0 : index
    %114 = vector.load %arg4[%c0_70, %c2_71, %c0_72] : memref<1x4x128xf32, #tpu.memory_space<vmem>>, vector<1x1x128xf32>
    %115 = vector.shape_cast %114 : vector<1x1x128xf32> to vector<1x128xf32>
    %116 = vector.shape_cast %113 : vector<1x128xf32> to vector<1x1x128xf32>
    tpu.vector_store %arg4[%c0_70, %c2_71, %c0_72], %116 {strides = array<i32>} : memref<1x4x128xf32, #tpu.memory_space<vmem>>, vector<1x1x128xf32>,
    %c0_73 = arith.constant 0 : index
    %c2_74 = arith.constant 2 : index
    %c0_75 = arith.constant 0 : index
    %117 = vector.load %arg5[%c0_73, %c2_74, %c0_75] : memref<1x4x128xf32, #tpu.memory_space<vmem>>, vector<1x1x128xf32>
    %118 = vector.shape_cast %117 : vector<1x1x128xf32> to vector<1x128xf32>
    %119 = arith.addf %108, %110 : vector<1x128xf32>
    %120 = arith.subf %119, %104 : vector<1x128xf32>
    %121 = arith.addf %118, %120 : vector<1x128xf32>
    %c0_76 = arith.constant 0 : index
    %c2_77 = arith.constant 2 : index
    %c0_78 = arith.constant 0 : index
    %122 = vector.load %arg5[%c0_76, %c2_77, %c0_78] : memref<1x4x128xf32, #tpu.memory_space<vmem>>, vector<1x1x128xf32>
    %123 = vector.shape_cast %122 : vector<1x1x128xf32> to vector<1x128xf32>
    %124 = vector.shape_cast %121 : vector<1x128xf32> to vector<1x1x128xf32>
    tpu.vector_store %arg5[%c0_76, %c2_77, %c0_78], %124 {strides = array<i32>} : memref<1x4x128xf32, #tpu.memory_space<vmem>>, vector<1x1x128xf32>,
    %c3_i32_79 = arith.constant 3 : i32
    %125 = vector.broadcast %c3_i32_79 : i32 to vector<8x128xi32>
    %126 = arith.cmpi eq, %34, %125 : vector<8x128xi32>
    %c0_80 = arith.constant 0 : index
    %c3_81 = arith.constant 3 : index
    %c0_82 = arith.constant 0 : index
    %c0_83 = arith.constant 0 : index
    %127 = vector.load %arg3[%c0_80, %c3_81, %c0_82, %c0_83] : memref<1x4x8x128xf32, #tpu.memory_space<vmem>>, vector<1x1x8x128xf32>
    %128 = vector.shape_cast %127 : vector<1x1x8x128xf32> to vector<8x128xf32>
    %cst_84 = arith.constant 0.000000e+00 : f32
    %129 = vector.broadcast %cst_84 : f32 to vector<8x128xf32>
    %130 = arith.select %32, %128, %129 : vector<8x128xi1>, vector<8x128xf32>
    %cst_85 = arith.constant 0.000000e+00 : f32
    %131 = vector.broadcast %cst_85 : f32 to vector<8x128xf32>
    %132 = arith.select %126, %130, %131 : vector<8x128xi1>, vector<8x128xf32>
    %cst_86 = arith.constant dense<0.000000e+00> : vector<128xf32>
    %133 = vector.multi_reduction <add>, %132, %cst_86 [0] : vector<8x128xf32> to vector<128xf32>
    %134 = vector.shape_cast %133 : vector<128xf32> to vector<1x128xf32>
    %135 = arith.extui %126 : vector<8x128xi1> to vector<8x128xi32>
    %136 = arith.sitofp %135 : vector<8x128xi32> to vector<8x128xf32>
    %cst_87 = arith.constant dense<0.000000e+00> : vector<128xf32>
    %137 = vector.multi_reduction <add>, %136, %cst_87 [0] : vector<8x128xf32> to vector<128xf32>
    %138 = vector.shape_cast %137 : vector<128xf32> to vector<1x128xf32>
    %cst_88 = arith.constant dense<0.000000e+00> : vector<128xf32>
    %139 = vector.multi_reduction <add>, %130, %cst_88 [0] : vector<8x128xf32> to vector<128xf32>
    %140 = vector.shape_cast %139 : vector<128xf32> to vector<1x128xf32>
    %c0_89 = arith.constant 0 : index
    %c3_90 = arith.constant 3 : index
    %c0_91 = arith.constant 0 : index
    %141 = vector.load %arg4[%c0_89, %c3_90, %c0_91] : memref<1x4x128xf32, #tpu.memory_space<vmem>>, vector<1x1x128xf32>
    %142 = vector.shape_cast %141 : vector<1x1x128xf32> to vector<1x128xf32>
    %143 = arith.addf %142, %134 : vector<1x128xf32>
    %c0_92 = arith.constant 0 : index
    %c3_93 = arith.constant 3 : index
    %c0_94 = arith.constant 0 : index
    %144 = vector.load %arg4[%c0_92, %c3_93, %c0_94] : memref<1x4x128xf32, #tpu.memory_space<vmem>>, vector<1x1x128xf32>
    %145 = vector.shape_cast %144 : vector<1x1x128xf32> to vector<1x128xf32>
    %146 = vector.shape_cast %143 : vector<1x128xf32> to vector<1x1x128xf32>
    tpu.vector_store %arg4[%c0_92, %c3_93, %c0_94], %146 {strides = array<i32>} : memref<1x4x128xf32, #tpu.memory_space<vmem>>, vector<1x1x128xf32>,
    %c0_95 = arith.constant 0 : index
    %c3_96 = arith.constant 3 : index
    %c0_97 = arith.constant 0 : index
    %147 = vector.load %arg5[%c0_95, %c3_96, %c0_97] : memref<1x4x128xf32, #tpu.memory_space<vmem>>, vector<1x1x128xf32>
    %148 = vector.shape_cast %147 : vector<1x1x128xf32> to vector<1x128xf32>
    %149 = arith.addf %138, %140 : vector<1x128xf32>
    %150 = arith.subf %149, %134 : vector<1x128xf32>
    %151 = arith.addf %148, %150 : vector<1x128xf32>
    %c0_98 = arith.constant 0 : index
    %c3_99 = arith.constant 3 : index
    %c0_100 = arith.constant 0 : index
    %152 = vector.load %arg5[%c0_98, %c3_99, %c0_100] : memref<1x4x128xf32, #tpu.memory_space<vmem>>, vector<1x1x128xf32>
    %153 = vector.shape_cast %152 : vector<1x1x128xf32> to vector<1x128xf32>
    %154 = vector.shape_cast %151 : vector<1x128xf32> to vector<1x1x128xf32>
    tpu.vector_store %arg5[%c0_98, %c3_99, %c0_100], %154 {strides = array<i32>} : memref<1x4x128xf32, #tpu.memory_space<vmem>>, vector<1x1x128xf32>,
    return
  }
  func.func @transform_0(%arg0: i32, %arg1: i32) -> (i32, i32, i32, i32) {
    %c0_i32 = arith.constant 0 : i32
    %c0_i32_0 = arith.constant 0 : i32
    %c0_i32_1 = arith.constant 0 : i32
    return %arg0, %c0_i32, %arg1, %c0_i32_0 : i32, i32, i32, i32
  }
  func.func @transform_1(%arg0: i32, %arg1: i32) -> (i32, i32, i32, i32) {
    %c0_i32 = arith.constant 0 : i32
    %c0_i32_0 = arith.constant 0 : i32
    %c0_i32_1 = arith.constant 0 : i32
    return %arg0, %c0_i32, %arg1, %c0_i32_0 : i32, i32, i32, i32
  }
  func.func @transform_2(%arg0: i32, %arg1: i32) -> (i32, i32, i32) {
    %c0_i32 = arith.constant 0 : i32
    %c0_i32_0 = arith.constant 0 : i32
    %c0_i32_1 = arith.constant 0 : i32
    return %arg0, %c0_i32, %c0_i32_0 : i32, i32, i32
  }
  func.func @transform_3(%arg0: i32, %arg1: i32) -> (i32, i32, i32) {
    %c0_i32 = arith.constant 0 : i32
    %c0_i32_0 = arith.constant 0 : i32
    %c0_i32_1 = arith.constant 0 : i32
    return %arg0, %c0_i32, %c0_i32_0 : i32, i32, i32
  }
}

</mosaic_0001>

<bundles_post_ra>
// kernel: tpu_custom_call.1
= control target key start
LH: loop header
LB: loop body
LE: loop exit
PB: predicated region body
PF: predicated region fallthrough
CT: control target
= control target key end

     0   :  { %s1131_s0 = inlined_call_operand.hbm [shape: f32[2,4,8,128], index: 0, kind: input, shape index: {}]   ;;  %s1132_s1 = inlined_call_operand.hbm [shape: f32[2,4,8,128], index: 1, kind: input, shape index: {}]   ;;  %s1133_s2 = inlined_call_operand.hbm [shape: f32[2,4,128], index: 2, kind: output, shape index: {0}]   ;;  %s1134_s3 = inlined_call_operand.hbm [shape: f32[2,4,128], index: 3, kind: output, shape index: {1}]  }
   0x1   :  { %1135 = sst [smem:[#allocation14_spill]] %s1131_s0 }
   0x2   :  { %9 = vsyncpa [#allocation3], 0 }
   0x3   :  { %11 = vsyncpa [#allocation3 + $0x1], 0 }
   0x4   :  { %12 = vsyncpa [#allocation6], 0 }
   0x5   :  { %14 = vsyncpa [#allocation6 + $0x1], 0 }
   0x6   :  { %15 = vsyncpa [#allocation4], 0 }
   0x7   :  { %17 = vsyncpa [#allocation4 + $0x1], 0 }
   0x8   :  { %18 = vsyncpa [#allocation9], 0 }
   0x9   :  { %20 = vsyncpa [#allocation9 + $0x1], 0  ;;  %s911_s12 = smov 0   ;;  %s913_s13 = smov 0  }
   0xa   :  { %s915_s14 = smov 0   ;;  %s917_s15 = smov 0  }
   0xb   :  { %s919_s16 = smov 0   ;;  %s921_s17 = smov 0  }
   0xc LB: > { %s598_s18 = sadd.s32 4294967295, %s885_s17   ;;  %s599_s19 = sadd.s32 4294967294, %s885_s17   ;;  %s885_s17 = sphi %s921_s17, %s26_s17   ;;  %s881_s16 = sphi %s919_s16, %s1146_s16   ;;  %s877_s15 = sphi %s917_s15, %s1145_s15   ;;  %s873_s14 = sphi %s915_s14, %s1144_s14   ;;  %s869_s13 = sphi %s913_s13, %s1143_s13   ;;  %s865_s12 = sphi %s911_s12, %s1142_s12  }
   0xd   : > { %s38_s20 = sadd.s32 1, %s881_s16  ;;  %s47_s21 = sadd.s32 1, %s873_s14 }
   0xe   : > { %p40_p0 = scmp.ge.s32.totalorder %s38_s20, 2  ;;  %p54_p1 = scmp.ne.s32.totalorder %s873_s14, %s869_s13 }
   0xf   : > { %p55_p2 = scmp.eq.s32.totalorder %s885_s17, 0  ;;  %p60_p3 = scmp.ne.s32.totalorder %s869_s13, %s865_s12 }
  0x10   : > { %s1148_s20 = smov (%p40_p0, %s38_s20), 0  ;;  %p61_p5 = scmp.eq.s32.totalorder %s598_s18, 0 }
  0x11   : > { %p952_p4 = por %p55_p2, %p54_p1  ;;  %s42_s23 = ssub.s32 %s881_s16, %s1148_s20 }
  0x12   : > { %p112_p6 = scmp.eq.s32.totalorder %s598_s18, 1  ;;  %p45_p7 = scmp.eq.s32.totalorder %s42_s23, 0 }
  0x13   : > { %p958_p8 = por %p61_p5, %p60_p3  ;;  %p118_p10 = scmp.eq.s32.totalorder %s599_s19, 1 }
  0x14   : > { %p962_p9 = por %p112_p6, %p54_p1  ;;  %p601_p12 = scmp.ge.s32.totalorder %s885_s17, 2 }
  0x15   : > { %s967_s26 = scalar_select %p45_p7, %s873_s14, %s47_s21  }
  0x16   : > { %p969_p11 = por %p118_p10, %p60_p3  ;;  %p653_p13 = scmp.lt.s32.totalorder %s885_s17, 2 }
  0x17   : > { %s976_s28 = sand.u32 1, %s873_s14   ;;  %s629_s30 = sshll.u32 %s881_s16, 5 }
  0x18   : > { %s602_s29 = sshll.u32 %s976_s28, 5  ;;  %s1140_s0 = sld [smem:[#allocation14_spill]] }
  0x19   : > { %s168_s7 = scalar_lea.vmem [#allocation2], %s602_s29  ;;  %p985_p0 = pnand %p653_p13, %p952_p4 }
  0x1a   : > { %s177_s8 = sshll.u32 %s168_s7, 4  ;;  %p608_p1 = scmp.ge.s32.totalorder %s885_s17, 1  ;;  %s178_s8 = int_to_ptr.vmem [resolvable:$true] %s177_s8 }
  0x1b   : > { %s165_s11 = scalar_lea.sflag [#allocation3], %s976_s28  ;;  %s887_s18 = smov 128  }
  0x1c   : > { %s888_s19 = smov 8   ;;  %p208_p2 = scmp.lt.s32.totalorder %s885_s17, 3 }
  0x1d   : > { %s197_s4 = scalar_lea.hbm %s1132_s1, %s629_s30  ;;  %s191_s22 = scalar_lea.vmem [#allocation5], %s602_s29 }
  0x1e   : > { %s174_s6 = scalar_lea.hbm %s1140_s0, %s629_s30  ;;  %p209_p3 = pnand %p608_p1, %p208_p2 }
  0x1f   : > { %s175_s9 = sshll.u32 %s174_s6, 4  ;;  %s198_s5 = sshll.u32 %s197_s4, 4  ;;  %s176_s9 = int_to_ptr.hbm [resolvable:$true] %s175_s9  ;;  %s199_s5 = int_to_ptr.hbm [resolvable:$true] %s198_s5 }
  0x20   : > { %642 = dma.hbm_to_vmem [thread:$0]  (!%p985_p0), %s176_s9, 512, %s178_s8, %s165_s11, %s887_s18, %s887_s18, %s888_s19  }
  0x21   : > { %s200_s6 = sshll.u32 %s191_s22, 4  ;;  %s188_s7 = scalar_lea.sflag [#allocation6], %s976_s28  ;;  %s201_s6 = int_to_ptr.vmem [resolvable:$true] %s200_s6 }
  0x22   : > { %645 = dma.hbm_to_vmem [thread:$0]  (!%p985_p0), %s199_s5, 512, %s201_s6, %s188_s7, %s887_s18, %s887_s18, %s888_s19  }
  0x23   : > { %212 = sbr.rel (%p209_p3) target bundleno = 97 (0x61), region = 28  ;;  %s1001_s0 = sand.u32 (!%p209_p3), 1, %s869_s13  }
  0x24   : > { %s609_s8 = sshll.u32 (!%p209_p3), %s1001_s0, 5  ;;  %s215_s9 = scalar_lea.sflag (!%p209_p3), [#allocation3], %s1001_s0 }
  0x25   : > { %s218_s11 = scalar_lea.vmem (!%p209_p3), [#allocation2], %s609_s8 }
  0x28   : > { %848 = dma.done.wait (%p958_p8), %s215_s9, 512  }
  0x29   : > { %850 = vsyncadd (%p958_p8), %s215_s9, 4294966784  ;;  %s225_s28 = scalar_lea.sflag [#allocation6], %s1001_s0  ;;  %s1010_s29 = scalar_lea.vmem [#allocation5], %s609_s8 }
  0x2a   : > { %852 = dma.done.wait (%p958_p8), %s225_s28, 512  }
  0x2b   : > { %854 = vsyncadd (%p958_p8), %s225_s28, 4294966784  ;;  %s611_s30 = sshll.u32 %s1001_s0, 2  ;;  %v283_v0 = vlaneseq  ;;  %v889_v1 = vmov 0.0   ;;  %v268_v6 = vld [vmem:[%s218_s11] sm:$0xff]  ;;  %v613_v7 = vld [vmem:[%s218_s11 + $0x8] sm:$0xff]  ;;  %v890_v11 = vmov 0  }
  0x2c   : > { %s1017_s10 = scalar_lea.vmem [#allocation7], %s611_s30  ;;  %s1021_s18 = scalar_lea.vmem [#allocation8], %s611_s30  ;;  %v614_v8 = vld [vmem:[%s218_s11 + $0x10] sm:$0xff]  ;;  %vm271_vm0 = vcmp.gt.f32.partialorder %v613_v7, %v268_v6  ;;  %v295_v9 = vld [vmem:[%s1010_s29] sm:$0xff]  ;;  %v617_v10 = vld [vmem:[%s1010_s29 + $0x8] sm:$0xff] }
  0x2d   : > { %266 = vst [vmem:[%s1017_s10] sm:$0xf] %v889_v1  ;;  %v284_v2 = vshrl.u32 %v283_v0, 7  ;;  %v286_v3 = vand.u32 127, %v283_v0  ;;  %v272_v12 = vsel %vm271_vm0, 1, %v890_v11  ;;  %v273_v13 = vsel %vm271_vm0, %v613_v7, %v268_v6  ;;  %v615_v14 = vld [vmem:[%s218_s11 + $0x18] sm:$0xff]  ;;  %v619_v17 = vld [vmem:[%s1010_s29 + $0x10] sm:$0xff] }
  0x2e   : > { %267 = vst [vmem:[%s1021_s18] sm:$0xf] %v889_v1  ;;  %vm276_vm2 = vcmp.gt.f32.partialorder %v614_v8, %v273_v13  ;;  %v621_v26 = vld [vmem:[%s1010_s29 + $0x18] sm:$0xff]  ;;  %s625_s24 = sshll.u32 %s877_s15, 2  ;;  %s443_s4 = sshll.u32 %s1017_s10, 4  ;;  %s444_s4 = int_to_ptr.vmem [resolvable:$true] %s443_s4 }
  0x2f   : > { %v290_v4 = vmul.u32 128, %v284_v2  ;;  %v277_v20 = vsel %vm276_vm2, 2, %v272_v12  ;;  %v278_v21 = vsel %vm276_vm2, %v614_v8, %v273_v13  ;;  %s441_s23 = scalar_lea.hbm %s1133_s2, %s625_s24  ;;  %s455_s7 = scalar_lea.hbm %s1134_s3, %s625_s24 }
  0x30   : > { %vm281_vm3 = vcmp.gt.f32.partialorder %v615_v14, %v278_v21  ;;  %s445_s5 = sshll.u32 %s441_s23, 4  ;;  %s426_s8 = scalar_lea.sflag [#allocation4], %s1001_s0  ;;  %s446_s5 = int_to_ptr.hbm [resolvable:$true] %s445_s5 }
  0x31   : > { %v291_v5 = vadd.s32 %v290_v4, %v286_v3  ;;  %v282_v27 = vsel %vm281_vm3, 3, %v277_v20  ;;  %s781_s9 = sshra.s32 %s446_s5, 4  ;;  %s787_s30 = scalar_lea.hbm %s1133_s2, 8  ;;  %s782_s9 = int_to_ptr.hbm [resolvable:$true] %s781_s9 }
  0x32   : > { %s783_s11 = scalar_lea.hbm %s782_s9, 4  ;;  %p788_p7 = scmp.lt.s32.totalorder %s782_s9, %s1133_s2 }
  0x33   : > { %vm292_vm1 = vcmp.lt.s32.totalorder %v291_v5, 256  ;;  %p784_p4 = scmp.ne.s32.totalorder %s782_s9, %s783_s11  ;;  %p789_p8 = scmp.lt.s32.totalorder %s787_s30, %s783_s11 }
  0x34   : > { %v296_v15 = vsel %vm292_vm1, %v295_v9, 0.0  ;;  %v329_v16 = vsel %vm292_vm1, %v617_v10, 0.0  ;;  %v362_v22 = vsel %vm292_vm1, %v619_v17, 0.0  ;;  %v1033_v28 = vsel %vm292_vm1, %v621_v26, 0.0  ;;  %v318_v7 = vld [vmem:[%s1017_s10] sm:$0x1] }
  0x35   : > { %v312_v18 = vrot.slane %v296_v15, 4  ;;  %v345_v19 = vrot.slane %v329_v16, 4  ;;  %v378_v25 = vrot.slane %v362_v22, 4  ;;  %v1036_v29 = vsel %vm292_vm1, %v282_v27, 4  ;;  %v351_v11 = vld [vmem:[%s1017_s10 + $0x1] sm:$0x1]  ;;  %p785_p5 = pnand %p784_p4, %p962_p9  ;;  %p790_p10 = por %p789_p8, %p788_p7 }
  0x36   : > { %vm294_vm4 = vcmp.eq.s32.totalorder %v1036_v29, 0  ;;  %vm326_vm5 = vcmp.eq.s32.totalorder %v1036_v29, 1  ;;  %vm359_vm6 = vcmp.eq.s32.totalorder %v1036_v29, 2  ;;  %vm392_vm7 = vcmp.eq.s32.totalorder %v1036_v29, 3  ;;  %v384_v21 = vld [vmem:[%s1017_s10 + $0x2] sm:$0x1] }
  0x37   : > { %v313_v23 = vadd.f32 %v312_v18, %v296_v15  ;;  %v346_v24 = vadd.f32 %v345_v19, %v329_v16  ;;  %v379_v32 = vadd.f32 %v378_v25, %v362_v22  ;;  %v297_v33 = vsel %vm294_vm4, %v296_v15, 0.0  ;;  %p786_p6 = pneg %p785_p5 }
  0x38   : > { %v616_v34 = vsel %vm294_vm4, 1.0, %v889_v1  ;;  %v330_v36 = vsel %vm326_vm5, %v329_v16, 0.0  ;;  %v298_v37 = vrot.slane %v297_v33, 4  ;;  %v618_v40 = vsel %vm326_vm5, 1.0, %v889_v1 }
  0x39   : > { %v314_v30 = vrot.slane %v313_v23, 2  ;;  %v347_v31 = vrot.slane %v346_v24, 2  ;;  %v306_v38 = vrot.slane %v616_v34, 4  ;;  %v331_v39 = vrot.slane %v330_v36, 4  ;;  %p791_p13 = pnand %p790_p10, %p786_p6 }
  0x3a   : > { %v339_v42 = vrot.slane %v618_v40, 4  ;;  %v363_v44 = vsel %vm359_vm6, %v362_v22, 0.0  ;;  %v299_v45 = vadd.f32 %v298_v37, %v297_v33  ;;  %v620_v52 = vsel %vm359_vm6, 1.0, %v889_v1  ;;  %v354_v37 = vld [vmem:[%s1021_s18 + $0x1] sm:$0x1] }
  0x3b   : > { %v315_v35 = vadd.f32 %v314_v30, %v313_v23  ;;  %v348_v43 = vadd.f32 %v347_v31, %v346_v24  ;;  %v307_v46 = vadd.f32 %v616_v34, %v306_v38  ;;  %v332_v47 = vadd.f32 %v331_v39, %v330_v36  ;;  %v321_v31 = vld [vmem:[%s1021_s18] sm:$0x1] }
  0x3c   : > { %v364_v48 = vrot.slane %v363_v44, 4  ;;  %v340_v50 = vadd.f32 %v618_v40, %v339_v42  ;;  %v300_v53 = vrot.slane %v299_v45, 2  ;;  %v372_v59 = vrot.slane %v620_v52, 4 }
  0x3d   : > { %v316_v41 = vrot.slane %v315_v35, 1  ;;  %v349_v51 = vrot.slane %v348_v43, 1  ;;  %v308_v54 = vrot.slane %v307_v46, 2  ;;  %v333_v55 = vrot.slane %v332_v47, 2 }
  0x3e   : > { %v365_v56 = vadd.f32 %v364_v48, %v363_v44  ;;  %v341_v57 = vrot.slane %v340_v50, 2  ;;  %v380_v60 = vrot.slane %v379_v32, 2  ;;  %v301_v61 = vadd.f32 %v300_v53, %v299_v45 }
  0x3f   : > { %v317_v49 = vadd.f32 %v316_v41, %v315_v35  ;;  %v350_v58 = vadd.f32 %v349_v51, %v348_v43  ;;  %v309_v62 = vadd.f32 %v308_v54, %v307_v46  ;;  %v334_v63 = vadd.f32 %v333_v55, %v332_v47  ;;  %v387_v46 = vld [vmem:[%s1021_s18 + $0x2] sm:$0x1] }
  0x40   : > { %v366_v0 = vrot.slane %v365_v56, 2  ;;  %v342_v2 = vadd.f32 %v341_v57, %v340_v50  ;;  %v373_v3 = vadd.f32 %v620_v52, %v372_v59  ;;  %v381_v4 = vadd.f32 %v380_v60, %v379_v32 }
  0x41   : > { %v396_v5 = vsel %vm392_vm7, %v1033_v28, 0.0  ;;  %v302_v6 = vrot.slane %v301_v61, 1  ;;  %v310_v8 = vrot.slane %v309_v62, 1  ;;  %v335_v9 = vrot.slane %v334_v63, 1 }
  0x42   : > { %v367_v10 = vadd.f32 %v366_v0, %v365_v56  ;;  %v343_v12 = vrot.slane %v342_v2, 1  ;;  %v374_v13 = vrot.slane %v373_v3, 2  ;;  %v382_v14 = vrot.slane %v381_v4, 1 }
  0x43   : > { %v397_v15 = vrot.slane %v396_v5, 4  ;;  %v303_v16 = vadd.f32 %v302_v6, %v301_v61  ;;  %v311_v17 = vadd.f32 %v310_v8, %v309_v62  ;;  %v336_v18 = vadd.f32 %v335_v9, %v334_v63 }
  0x44   : > { %v368_v19 = vrot.slane %v367_v10, 1  ;;  %v344_v20 = vadd.f32 %v343_v12, %v342_v2  ;;  %v375_v22 = vadd.f32 %v374_v13, %v373_v3  ;;  %v383_v23 = vadd.f32 %v382_v14, %v381_v4 }
  0x45   : > { %v398_v24 = vadd.f32 %v397_v15, %v396_v5  ;;  %v319_v25 = vadd.f32 %v318_v7, %v303_v16  ;;  %v322_v26 = vadd.f32 %v317_v49, %v311_v17  ;;  %v352_v27 = vadd.f32 %v351_v11, %v336_v18  ;;  %v417_v49 = vld [vmem:[%s1017_s10 + $0x3] sm:$0x1] }
  0x46   : > { %v369_v30 = vadd.f32 %v368_v19, %v367_v10  ;;  %v355_v32 = vadd.f32 %v350_v58, %v344_v20  ;;  %v376_v33 = vrot.slane %v375_v22, 1  ;;  %v622_v35 = vsel %vm392_vm7, 1.0, %v889_v1 }
  0x47   : > { %v399_v34 = vrot.slane %v398_v24, 2  ;;  %320 = vst [vmem:[%s1017_s10] sm:$0x1] %v319_v25  ;;  %v323_v36 = vsub.f32 %v322_v26, %v303_v16  ;;  %v405_v39 = vrot.slane %v622_v35, 4  ;;  %v411_v40 = vrot.slane %v1033_v28, 4 }
  0x48   : > { %v385_v38 = vadd.f32 %v384_v21, %v369_v30  ;;  %353 = vst [vmem:[%s1017_s10 + $0x1] sm:$0x1] %v352_v27  ;;  %v356_v41 = vsub.f32 %v355_v32, %v336_v18  ;;  %v377_v42 = vadd.f32 %v376_v33, %v375_v22 }
  0x49   : > { %v400_v43 = vadd.f32 %v399_v34, %v398_v24  ;;  %v324_v44 = vadd.f32 %v323_v36, %v321_v31  ;;  %v406_v1 = vadd.f32 %v622_v35, %v405_v39  ;;  %v412_v29 = vadd.f32 %v411_v40, %v1033_v28 }
  0x4a   : > { %386 = vst [vmem:[%s1017_s10 + $0x2] sm:$0x1] %v385_v38  ;;  %v357_v45 = vadd.f32 %v356_v41, %v354_v37  ;;  %v388_v47 = vadd.f32 %v383_v23, %v377_v42 }
  0x4b   : > { %v401_v48 = vrot.slane %v400_v43, 1  ;;  %325 = vst [vmem:[%s1021_s18] sm:$0x1] %v324_v44  ;;  %v407_v50 = vrot.slane %v406_v1, 2  ;;  %v413_v51 = vrot.slane %v412_v29, 2 }
  0x4c   : > { %358 = vst [vmem:[%s1021_s18 + $0x1] sm:$0x1] %v357_v45  ;;  %v389_v52 = vsub.f32 %v388_v47, %v369_v30 }
  0x4d   : > { %v402_v53 = vadd.f32 %v401_v48, %v400_v43  ;;  %v408_v28 = vadd.f32 %v407_v50, %v406_v1  ;;  %v414_v54 = vadd.f32 %v413_v51, %v412_v29 }
  0x4e   : > { %v390_v55 = vadd.f32 %v389_v52, %v387_v46 }
  0x4f   : > { %v418_v56 = vadd.f32 %v417_v49, %v402_v53  ;;  %v409_v57 = vrot.slane %v408_v28, 1  ;;  %v415_v58 = vrot.slane %v414_v54, 1 }
  0x50   : > { %391 = vst [vmem:[%s1021_s18 + $0x2] sm:$0x1] %v390_v55 }
  0x51   : > { %419 = vst [vmem:[%s1017_s10 + $0x3] sm:$0x1] %v418_v56  ;;  %v410_v59 = vadd.f32 %v409_v57, %v408_v28  ;;  %v416_v60 = vadd.f32 %v415_v58, %v414_v54 }
  0x52   : > { %794 = shalt.err (!%p791_p13)
}
  0x53   : > { %635 = dma.vmem_to_hbm [thread:$0]  (%p962_p9), %s444_s4, 64, %s446_s5, %s426_s8   ;;  %v421_v61 = vadd.f32 %v416_v60, %v410_v59  ;;  %v420_v62 = vld [vmem:[%s1021_s18 + $0x3] sm:$0x1] }
  0x54   : > { %s457_s15 = sshll.u32 %s1021_s18, 4  ;;  %s459_s24 = sshll.u32 %s455_s7, 4  ;;  %s458_s15 = int_to_ptr.vmem [resolvable:$true] %s457_s15  ;;  %s460_s24 = int_to_ptr.hbm [resolvable:$true] %s459_s24 }
  0x55   : > { %v422_v63 = vsub.f32 %v421_v61, %v402_v53  ;;  %s431_s21 = scalar_lea.sflag [#allocation9], %s1001_s0  ;;  %s809_s23 = sshra.s32 %s460_s24, 4  ;;  %s810_s23 = int_to_ptr.hbm [resolvable:$true] %s809_s23 }
  0x56   : > { %s811_s22 = scalar_lea.hbm %s810_s23, 4  ;;  %s815_s4 = scalar_lea.hbm %s1134_s3, 8 }
  0x57   : > { %v423_v0 = vadd.f32 %v422_v63, %v420_v62  ;;  %p812_p0 = scmp.ne.s32.totalorder %s810_s23, %s811_s22  ;;  %p816_p3 = scmp.lt.s32.totalorder %s810_s23, %s1134_s3 }
  0x58   : > { %p817_p4 = scmp.lt.s32.totalorder %s815_s4, %s811_s22 }
  0x59   : > { %424 = vst [vmem:[%s1021_s18 + $0x3] sm:$0x1] %v423_v0  ;;  %p813_p1 = pnand %p812_p0, %p962_p9 }
  0x5a   : > { %p818_p5 = por %p817_p4, %p816_p3 }
  0x5b   : > { %p814_p2 = pneg %p813_p1 }
  0x5d   : > { %p819_p6 = pnand %p818_p5, %p814_p2 }
  0x5f   : > { %822 = shalt.err (!%p819_p6)
}
  0x60   : > { %636 = dma.vmem_to_hbm [thread:$0]  (%p962_p9), %s458_s15, 64, %s460_s24, %s431_s21  }
  0x61 PF: > { %s471_s0 = sand.u32 1, %s865_s12   ;;  %p647_p7 = pnand %p601_p12, %p969_p11 }
  0x62   : > { %s472_s18 = scalar_lea.sflag [#allocation4], %s471_s0 }
  0x63   : > { %p648_p8 = pneg %p647_p7 }
  0x65   : > { %856 = dma.done.wait (%p648_p8), %s472_s18, 64  }
  0x66   : > { %858 = vsyncadd (%p648_p8), %s472_s18, 4294967232  ;;  %s482_s7 = scalar_lea.sflag [#allocation9], %s471_s0 }
  0x67   : > { %860 = dma.done.wait (%p648_p8), %s482_s7, 64  }
  0x68   : > { %862 = vsyncadd (%p648_p8), %s482_s7, 4294967232  ;;  %s26_s17 = sadd.s32 1, %s885_s17   ;;  %s1142_s12 = smov %s869_s13 }
  0x69   : > { %p23_p10 = scmp.ge.s32.totalorder %s26_s17, 4   ;;  %s1143_s13 = smov %s873_s14 }
  0x6a   : > { %s1144_s14 = smov %s967_s26  ;;  %s1145_s15 = smov %s881_s16 }
  0x6b   : > { %s1146_s16 = smov %s1148_s20  ;;  %25 = sbr.rel (!%p23_p10) target bundleno = 12 (0xc), region = 113 }
  0x70   :  { %488 = vsyncpa [#allocation3], 1 }
  0x71   :  { %490 = vsyncpa [#allocation3 + $0x1], 1 }
  0x72   :  { %491 = vsyncpa [#allocation6], 1 }
  0x73   :  { %493 = vsyncpa [#allocation6 + $0x1], 1 }
  0x74   :  { %494 = vsyncpa [#allocation4], 1 }
  0x75   :  { %496 = vsyncpa [#allocation4 + $0x1], 1 }
  0x76   :  { %497 = vsyncpa [#allocation9], 1 }
  0x77   :  { %499 = vsyncpa [#allocation9 + $0x1], 1 }

</bundles_post_ra>
